<compile_context>
chip_gen: v5e
topology: v5e:2x2
jax: 0.10.0
libtpu: 0.0.40
codegen_flags: <defaults>
</compile_context>

<pallas_src>
import functools

import jax
import jax.numpy as jnp
import numpy as np
from jax import lax
from jax.experimental import pallas as pl
from jax.experimental.pallas import tpu as pltpu

BN_EPS = 1e-5
LANE = 128
SUBLANE = 8


def _round_up(x, m):
    return (x + m - 1) // m * m


# ---------------------------------------------------------------------------
# Kernels
# ---------------------------------------------------------------------------
def _fused_small_kernel(p_ref, w_ref, g_ref, b_ref, o_ref, acc_ref, *,
                        inv_count, c_out):
    """Whole problem in one grid step: conv + batch stats + BN + ReLU.

    p_ref: (Mp, Kp) bf16  im2col patches      w_ref: (Kp, Cp) bf16 weights
    g_ref/b_ref: (1, Cp) f32 gamma/beta       o_ref: (Mp, c_out) f32 output
    acc_ref: (Mp, Cp) f32 VMEM scratch holding the conv result.
    """
    acc_ref[...] = jnp.dot(p_ref[...], w_ref[...],
                           preferred_element_type=jnp.float32)
    conv = acc_ref[...]
    s = jnp.sum(conv, axis=0, keepdims=True)             # (1, Cp)
    sq = jnp.sum(conv * conv, axis=0, keepdims=True)     # (1, Cp)
    mean = s * inv_count
    var = jnp.maximum(sq * inv_count - mean * mean, 0.0)
    scale = lax.rsqrt(var + BN_EPS) * g_ref[...]          # (1, Cp)
    shift = b_ref[...] - mean * scale                     # (1, Cp)
    bn = jnp.maximum(conv * scale + shift, 0.0)
    o_ref[...] = bn[:, :c_out]                            # unpadded store


def _stats_kernel(p_ref, w_ref, part_ref):
    """Per-M-tile partial stats (no conv writeback).

    part_ref: (8, Cp) f32 — row 0 = sum, row 1 = sumsq, rows 2..7 = 0.
    Each grid step owns its own (8, Cp) slab -> axis can be "parallel".
    """
    conv = jnp.dot(p_ref[...], w_ref[...], preferred_element_type=jnp.float32)
    part_ref[...] = jnp.zeros_like(part_ref)
    part_ref[0:1, :] = jnp.sum(conv, axis=0, keepdims=True)
    part_ref[1:2, :] = jnp.sum(conv * conv, axis=0, keepdims=True)


def _apply_kernel(p_ref, w_ref, scale_ref, shift_ref, o_ref, *, c_out):
    """Recompute the conv tile and apply BN (precomputed scale/shift) + ReLU."""
    conv = jnp.dot(p_ref[...], w_ref[...], preferred_element_type=jnp.float32)
    bn = jnp.maximum(conv * scale_ref[...] + shift_ref[...], 0.0)
    o_ref[...] = bn[:, :c_out]                            # unpadded store


# ---------------------------------------------------------------------------
# Wrapper
# ---------------------------------------------------------------------------
@functools.partial(jax.jit,
                   static_argnames=("compute_dtype", "tile_m",
                                    "small_path_bytes"))
def encoder_block_forward(x_nchw, conv_w, gamma, beta, *,
                          compute_dtype=jnp.bfloat16, tile_m=1024,
                          small_path_bytes=6 * 1024 * 1024):
    """x_nchw: (N, C_in, H, W); conv_w: (C_out, C_in, 5, 5) OIHW;
    gamma/beta: (C_out,).  Returns (N, C_out, H_out, W_out) float32."""
    N, C_in, H, W = x_nchw.shape
    C_out = conv_w.shape[0]
    KH = KW = 5
    stride = 2
    pad = 2
    H_out = (H + 2 * pad - KH) // stride + 1
    W_out = (W + 2 * pad - KW) // stride + 1

    M = N * H_out * W_out
    K = KH * KW * C_in
    Kp = _round_up(K, LANE)
    Cp = _round_up(C_out, LANE)
    itemsize = jnp.dtype(compute_dtype).itemsize
    inv_count = 1.0 / float(M)

    # --- im2col glue in XLA (bf16), rows ordered (n, oh, ow) ---
    x_nhwc = jnp.transpose(x_nchw, (0, 2, 3, 1))
    xp = jnp.pad(x_nhwc, ((0, 0), (pad, pad), (pad, pad), (0, 0)))
    taps = []
    for kh in range(KH):
        for kw in range(KW):
            taps.append(
                xp[:, kh:kh + stride * (H_out - 1) + 1:stride,
                      kw:kw + stride * (W_out - 1) + 1:stride, :])
    patches = jnp.stack(taps, axis=3).reshape(M, K).astype(compute_dtype)

    # (C_out, C_in, KH, KW) -> (KH, KW, C_in, C_out) -> (K, C_out), padded.
    w_mat = jnp.transpose(conv_w, (2, 3, 1, 0)).reshape(K, C_out)
    w_mat = jnp.pad(w_mat, ((0, Kp - K), (0, Cp - C_out))).astype(compute_dtype)
    g2 = jnp.pad(gamma.astype(jnp.float32), (0, Cp - C_out)).reshape(1, Cp)
    b2 = jnp.pad(beta.astype(jnp.float32), (0, Cp - C_out)).reshape(1, Cp)

    Mp_small = _round_up(M, SUBLANE)
    small_bytes = (Mp_small * Kp * itemsize + Kp * Cp * itemsize
                   + Mp_small * Cp * 4 + Mp_small * C_out * 4)

    if small_bytes <= small_path_bytes:
        # ---- Small path: single fused call, everything resident in VMEM ----
        Mp = Mp_small
        p = jnp.pad(patches, ((0, Mp - M), (0, Kp - K)))
        out2d = pl.pallas_call(
            functools.partial(_fused_small_kernel,
                              inv_count=inv_count, c_out=C_out),
            out_shape=jax.ShapeDtypeStruct((Mp, C_out), jnp.float32),
            grid=(1,),
            in_specs=[
                pl.BlockSpec((Mp, Kp), lambda i: (0, 0)),
                pl.BlockSpec((Kp, Cp), lambda i: (0, 0)),
                pl.BlockSpec((1, Cp), lambda i: (0, 0)),
                pl.BlockSpec((1, Cp), lambda i: (0, 0)),
            ],
            out_specs=pl.BlockSpec((Mp, C_out), lambda i: (0, 0)),
            scratch_shapes=[pltpu.VMEM((Mp, Cp), jnp.float32)],
            compiler_params=pltpu.CompilerParams(
                dimension_semantics=("arbitrary",),
                vmem_limit_bytes=32 * 1024 * 1024),
            cost_estimate=pl.CostEstimate(
                flops=2 * Mp * Kp * Cp, transcendentals=0,
                bytes_accessed=(Mp * Kp * itemsize + Kp * Cp * itemsize
                                + Mp * C_out * 4)),
        )(p, w_mat, g2, b2)
    else:
        # ---- Large path: stats call (parallel) + tiny XLA fold + apply call ---
        TILE_M = min(tile_m, _round_up(M, SUBLANE))
        # keep the double-buffered per-step working set well inside VMEM
        while TILE_M > SUBLANE and \
                2 * (TILE_M * Kp * itemsize + TILE_M * Cp * 4) > 24 * 1024 * 1024:
            TILE_M = max(SUBLANE, _round_up(TILE_M // 2, SUBLANE))
        n_tiles = -(-M // TILE_M)
        TILE_M = _round_up(-(-M // n_tiles), SUBLANE)   # rebalance last tile
        Mp = TILE_M * n_tiles
        p = jnp.pad(patches, ((0, Mp - M), (0, Kp - K)))

        parts = pl.pallas_call(
            _stats_kernel,
            out_shape=jax.ShapeDtypeStruct((n_tiles * SUBLANE, Cp), jnp.float32),
            grid=(n_tiles,),
            in_specs=[
                pl.BlockSpec((TILE_M, Kp), lambda i: (i, 0)),
                pl.BlockSpec((Kp, Cp), lambda i: (0, 0)),
            ],
            out_specs=pl.BlockSpec((SUBLANE, Cp), lambda i: (i, 0)),
            compiler_params=pltpu.CompilerParams(
                dimension_semantics=("parallel",),
                vmem_limit_bytes=32 * 1024 * 1024),
            cost_estimate=pl.CostEstimate(
                flops=2 * Mp * Kp * Cp, transcendentals=0,
                bytes_accessed=(Mp * Kp * itemsize + Kp * Cp * itemsize
                                + n_tiles * SUBLANE * Cp * 4)),
        )(p, w_mat)

        parts = parts.reshape(n_tiles, SUBLANE, Cp)
        s = jnp.sum(parts[:, 0, :], axis=0)               # (Cp,)
        sq = jnp.sum(parts[:, 1, :], axis=0)               # (Cp,)
        mean = s * inv_count
        var = jnp.maximum(sq * inv_count - mean * mean, 0.0)
        scale = lax.rsqrt(var + BN_EPS) * g2[0]             # (Cp,)
        shift = b2[0] - mean * scale                        # (Cp,)
        scale = scale.reshape(1, Cp)
        shift = shift.reshape(1, Cp)

        out2d = pl.pallas_call(
            functools.partial(_apply_kernel, c_out=C_out),
            out_shape=jax.ShapeDtypeStruct((Mp, C_out), jnp.float32),
            grid=(n_tiles,),
            in_specs=[
                pl.BlockSpec((TILE_M, Kp), lambda i: (i, 0)),
                pl.BlockSpec((Kp, Cp), lambda i: (0, 0)),
                pl.BlockSpec((1, Cp), lambda i: (0, 0)),
                pl.BlockSpec((1, Cp), lambda i: (0, 0)),
            ],
            out_specs=pl.BlockSpec((TILE_M, C_out), lambda i: (i, 0)),
            compiler_params=pltpu.CompilerParams(
                dimension_semantics=("parallel",),
                vmem_limit_bytes=32 * 1024 * 1024),
            cost_estimate=pl.CostEstimate(
                flops=2 * Mp * Kp * Cp, transcendentals=0,
                bytes_accessed=(Mp * Kp * itemsize + Kp * Cp * itemsize
                                + Mp * C_out * 4)),
        )(p, w_mat, scale, shift)

    # Compact (unpadded) NHWC -> NCHW; only M*C_out elements move here.
    out = out2d[:M].reshape(N, H_out, W_out, C_out)
    return jnp.transpose(out, (0, 3, 1, 2))


# ---------------------------------------------------------------------------
# Reference (same matmul precision: bf16 operands, f32 accumulation; BN in f32)
# ---------------------------------------------------------------------------
def _reference_forward(x_nchw, conv_w, gamma, beta, compute_dtype=jnp.bfloat16):
    conv = lax.conv_general_dilated(
        x_nchw.astype(compute_dtype), conv_w.astype(compute_dtype),
        window_strides=(2, 2), padding=((2, 2), (2, 2)),
        dimension_numbers=("NCHW", "OIHW", "NCHW"),
        preferred_element_type=jnp.float32)
    mean = jnp.mean(conv, axis=(0, 2, 3), keepdims=True)
    var = jnp.mean((conv - mean) ** 2, axis=(0, 2, 3), keepdims=True)
    bn = (conv - mean) * lax.rsqrt(var + BN_EPS)
    bn = bn * gamma.reshape(1, -1, 1, 1) + beta.reshape(1, -1, 1, 1)
    return jnp.maximum(bn, 0.0)


if __name__ == "__main__":
    # Shapes consistent with EncoderBlock(channel_in=4, channel_out=8).
    N, C_in, H, W = 2, 4, 16, 16
    C_out = 8

    key = jax.random.PRNGKey(0)
    kx, kw, kg, kb = jax.random.split(key, 4)
    x = jax.random.normal(kx, (N, C_in, H, W), dtype=jnp.float32)
    conv_w = jax.random.normal(kw, (C_out, C_in, 5, 5), dtype=jnp.float32) * 0.1
    gamma = 1.0 + 0.1 * jax.random.normal(kg, (C_out,), dtype=jnp.float32)
    beta = 0.1 * jax.random.normal(kb, (C_out,), dtype=jnp.float32)

    ref = jax.block_until_ready(_reference_forward(x, conv_w, gamma, beta))

    # 1) default dispatch -> fused single-call small path
    out = jax.block_until_ready(encoder_block_forward(x, conv_w, gamma, beta))
    assert out.shape == (N, C_out, H // 2, W // 2), out.shape
    assert np.allclose(np.asarray(out), np.asarray(ref), atol=2e-3, rtol=2e-3), \
        "small-path mismatch vs reference"

    # 2) force the tiled stats+apply (large) path to exercise those kernels too
    out2 = jax.block_until_ready(
        encoder_block_forward(x, conv_w, gamma, beta,
                              tile_m=64, small_path_bytes=0))
    assert np.allclose(np.asarray(out2), np.asarray(ref), atol=2e-3, rtol=2e-3), \
        "large-path mismatch vs reference"

    print("KERNEL_OK")
</pallas_src>

<mosaic_0001>
module attributes {stable_mosaic.version = 11 : i64} {
  func.func @_fused_small_kernel(%arg0: i32, %arg1: memref<128x128xbf16, #tpu.memory_space<vmem>>, %arg2: memref<128x128xbf16, #tpu.memory_space<vmem>>, %arg3: memref<1x128xf32, #tpu.memory_space<vmem>>, %arg4: memref<1x128xf32, #tpu.memory_space<vmem>>, %arg5: memref<128x8xf32, #tpu.memory_space<vmem>>, %arg6: memref<128x128xf32, #tpu.memory_space<vmem>>) attributes {dimension_semantics = [#tpu.dimension_semantics<arbitrary>], iteration_bounds = array<i64: 1>, scalar_prefetch = 0 : i64, scratch_operands = 1 : i64, tpu.core_type = #tpu.core_type<tc>, window_params = [{pipeline_mode = #tpu.pipeline_mode<synchronous>, transform_indices = @transform_0, window_bounds = array<i64: 128, 128>}, {pipeline_mode = #tpu.pipeline_mode<synchronous>, transform_indices = @transform_1, window_bounds = array<i64: 128, 128>}, {pipeline_mode = #tpu.pipeline_mode<synchronous>, transform_indices = @transform_2, window_bounds = array<i64: 1, 128>}, {pipeline_mode = #tpu.pipeline_mode<synchronous>, transform_indices = @transform_3, window_bounds = array<i64: 1, 128>}, {pipeline_mode = #tpu.pipeline_mode<synchronous>, transform_indices = @transform_4, window_bounds = array<i64: 128, 8>}]} {
    %c0 = arith.constant 0 : index
    %c0_0 = arith.constant 0 : index
    %0 = vector.load %arg1[%c0, %c0_0] : memref<128x128xbf16, #tpu.memory_space<vmem>>, vector<128x128xbf16>
    %c0_1 = arith.constant 0 : index
    %c0_2 = arith.constant 0 : index
    %1 = vector.load %arg2[%c0_1, %c0_2] : memref<128x128xbf16, #tpu.memory_space<vmem>>, vector<128x128xbf16>
    %cst = arith.constant dense<0.000000e+00> : vector<128x128xf32>
    %2 = tpu.matmul %0, %1, %cst {dimension_numbers = #tpu.dot_dimension_numbers<[1], [0], [0], [1], [0, 0, 1, 1], [], []>} : vector<128x128xbf16>, vector<128x128xbf16>, vector<128x128xf32> -> vector<128x128xf32>
    %c0_3 = arith.constant 0 : index
    %c0_4 = arith.constant 0 : index
    %3 = vector.load %arg6[%c0_3, %c0_4] : memref<128x128xf32, #tpu.memory_space<vmem>>, vector<128x128xf32>
    tpu.vector_store %arg6[%c0_3, %c0_4], %2 {strides = array<i32>} : memref<128x128xf32, #tpu.memory_space<vmem>>, vector<128x128xf32>,
    %c0_5 = arith.constant 0 : index
    %c0_6 = arith.constant 0 : index
    %4 = vector.load %arg6[%c0_5, %c0_6] : memref<128x128xf32, #tpu.memory_space<vmem>>, vector<128x128xf32>
    %cst_7 = arith.constant dense<0.000000e+00> : vector<128xf32>
    %5 = vector.multi_reduction <add>, %4, %cst_7 [0] : vector<128x128xf32> to vector<128xf32>
    %6 = vector.shape_cast %5 : vector<128xf32> to vector<1x128xf32>
    %7 = arith.mulf %4, %4 : vector<128x128xf32>
    %cst_8 = arith.constant dense<0.000000e+00> : vector<128xf32>
    %8 = vector.multi_reduction <add>, %7, %cst_8 [0] : vector<128x128xf32> to vector<128xf32>
    %9 = vector.shape_cast %8 : vector<128xf32> to vector<1x128xf32>
    %cst_9 = arith.constant 7.812500e-03 : f32
    %10 = vector.broadcast %cst_9 : f32 to vector<1x128xf32>
    %11 = arith.mulf %6, %10 : vector<1x128xf32>
    %cst_10 = arith.constant 7.812500e-03 : f32
    %12 = vector.broadcast %cst_10 : f32 to vector<1x128xf32>
    %13 = arith.mulf %9, %12 : vector<1x128xf32>
    %14 = arith.mulf %11, %11 : vector<1x128xf32>
    %15 = arith.subf %13, %14 : vector<1x128xf32>
    %cst_11 = arith.constant 0.000000e+00 : f32
    %16 = vector.broadcast %cst_11 : f32 to vector<1x128xf32>
    %17 = arith.maximumf %15, %16 : vector<1x128xf32>
    %cst_12 = arith.constant 9.99999974E-6 : f32
    %18 = vector.broadcast %cst_12 : f32 to vector<1x128xf32>
    %19 = arith.addf %17, %18 : vector<1x128xf32>
    %20 = math.rsqrt %19 : vector<1x128xf32>
    %c0_13 = arith.constant 0 : index
    %c0_14 = arith.constant 0 : index
    %21 = vector.load %arg3[%c0_13, %c0_14] : memref<1x128xf32, #tpu.memory_space<vmem>>, vector<1x128xf32>
    %22 = arith.mulf %20, %21 : vector<1x128xf32>
    %c0_15 = arith.constant 0 : index
    %c0_16 = arith.constant 0 : index
    %23 = vector.load %arg4[%c0_15, %c0_16] : memref<1x128xf32, #tpu.memory_space<vmem>>, vector<1x128xf32>
    %24 = arith.mulf %11, %22 : vector<1x128xf32>
    %25 = arith.subf %23, %24 : vector<1x128xf32>
    %26 = vector.broadcast %22 : vector<1x128xf32> to vector<128x128xf32>
    %27 = arith.mulf %4, %26 : vector<128x128xf32>
    %28 = vector.broadcast %25 : vector<1x128xf32> to vector<128x128xf32>
    %29 = arith.addf %27, %28 : vector<128x128xf32>
    %cst_17 = arith.constant 0.000000e+00 : f32
    %30 = vector.broadcast %cst_17 : f32 to vector<128x128xf32>
    %31 = arith.maximumf %29, %30 : vector<128x128xf32>
    %32 = vector.extract_strided_slice %31 {offsets = [0, 0], sizes = [128, 8], strides = [1, 1]} : vector<128x128xf32> to vector<128x8xf32>
    %c0_18 = arith.constant 0 : index
    %c0_19 = arith.constant 0 : index
    %33 = vector.load %arg5[%c0_18, %c0_19] : memref<128x8xf32, #tpu.memory_space<vmem>>, vector<128x8xf32>
    tpu.vector_store %arg5[%c0_18, %c0_19], %32 {strides = array<i32>} : memref<128x8xf32, #tpu.memory_space<vmem>>, vector<128x8xf32>,
    return
  }
  func.func @transform_0(%arg0: i32) -> (i32, i32) {
    %c0_i32 = arith.constant 0 : i32
    %c0_i32_0 = arith.constant 0 : i32
    %c0_i32_1 = arith.constant 0 : i32
    return %c0_i32, %c0_i32_0 : i32, i32
  }
  func.func @transform_1(%arg0: i32) -> (i32, i32) {
    %c0_i32 = arith.constant 0 : i32
    %c0_i32_0 = arith.constant 0 : i32
    %c0_i32_1 = arith.constant 0 : i32
    return %c0_i32, %c0_i32_0 : i32, i32
  }
  func.func @transform_2(%arg0: i32) -> (i32, i32) {
    %c0_i32 = arith.constant 0 : i32
    %c0_i32_0 = arith.constant 0 : i32
    %c0_i32_1 = arith.constant 0 : i32
    return %c0_i32, %c0_i32_0 : i32, i32
  }
  func.func @transform_3(%arg0: i32) -> (i32, i32) {
    %c0_i32 = arith.constant 0 : i32
    %c0_i32_0 = arith.constant 0 : i32
    %c0_i32_1 = arith.constant 0 : i32
    return %c0_i32, %c0_i32_0 : i32, i32
  }
  func.func @transform_4(%arg0: i32) -> (i32, i32) {
    %c0_i32 = arith.constant 0 : i32
    %c0_i32_0 = arith.constant 0 : i32
    %c0_i32_1 = arith.constant 0 : i32
    return %c0_i32, %c0_i32_0 : i32, i32
  }
}

</mosaic_0001>

<bundles_post_ra>
// kernel: encoder_block_forward.1
= control target key start
LH: loop header
LB: loop body
LE: loop exit
PB: predicated region body
PF: predicated region fallthrough
CT: control target
= control target key end

     0   :  { %vm357_vm3 = vcmask 64512   ;;  %s723_s1 = inlined_call_operand.vmem [shape: bf16[128,128], index: 1, kind: input, shape index: {}]   ;;  %s724_s0 = inlined_call_operand.vmem [shape: bf16[128,128], index: 0, kind: input, shape index: {}]   ;;  %s725_s2 = inlined_call_operand.vmem [shape: f32[1,128], index: 2, kind: input, shape index: {}]   ;;  %s726_s3 = inlined_call_operand.vmem [shape: f32[1,128], index: 3, kind: input, shape index: {}]   ;;  %s727_s4 = inlined_call_operand.vmem [shape: f32[128,8], index: 4, kind: output, shape index: {}]  }
   0x1   :  { %v457_v0 = vld [vmem:[%s723_s1 + $0x38] sm:$0xff]  ;;  %v456_v1 = vld [vmem:[%s723_s1 + $0x30] sm:$0xff]  ;;  %v455_v2 = vld [vmem:[%s723_s1 + $0x28] sm:$0xff] }
   0x2   :  { %145 = vmatpush.bf16.msra.mxu0 %v457_v0  ;;  %458 = vmatpush.bf16.msra.mxu1 %v457_v0  ;;  %v454_v3 = vld [vmem:[%s723_s1 + $0x20] sm:$0xff]  ;;  %v453_v4 = vld [vmem:[%s723_s1 + $0x18] sm:$0xff]  ;;  %v452_v5 = vld [vmem:[%s723_s1 + $0x10] sm:$0xff] }
   0x3   :  { %459 = vmatpush.bf16.msra.mxu2 %v457_v0  ;;  %460 = vmatpush.bf16.msra.mxu3 %v457_v0  ;;  %v451_v6 = vld [vmem:[%s723_s1 + $0x8] sm:$0xff]  ;;  %v450_v7 = vld [vmem:[%s723_s1] sm:$0xff]  ;;  %v444_v9 = vld [vmem:[%s724_s0 + $0x10] sm:$0xff] }
   0x4   :  { %v442_v8 = vld [vmem:[%s724_s0] sm:$0xff]  ;;  %v448_v11 = vld [vmem:[%s724_s0 + $0x30] sm:$0xff]  ;;  %v443_v12 = vld [vmem:[%s724_s0 + $0x8] sm:$0xff] }
   0x5   :  { %v446_v10 = vld [vmem:[%s724_s0 + $0x20] sm:$0xff]  ;;  %v445_v13 = vld [vmem:[%s724_s0 + $0x18] sm:$0xff]  ;;  %v447_v14 = vld [vmem:[%s724_s0 + $0x28] sm:$0xff] }
   0x6   :  { %146 = vmatpush.bf16.msra.mxu0 %v456_v1  ;;  %461 = vmatpush.bf16.msra.mxu1 %v456_v1  ;;  %v449_v15 = vld [vmem:[%s724_s0 + $0x38] sm:$0xff] }
   0x7   :  { %462 = vmatpush.bf16.msra.mxu2 %v456_v1  ;;  %463 = vmatpush.bf16.msra.mxu3 %v456_v1 }
   0xa   :  { %147 = vmatpush.bf16.msra.mxu0 %v455_v2  ;;  %464 = vmatpush.bf16.msra.mxu1 %v455_v2 }
   0xb   :  { %465 = vmatpush.bf16.msra.mxu2 %v455_v2  ;;  %466 = vmatpush.bf16.msra.mxu3 %v455_v2 }
   0xe   :  { %148 = vmatpush.bf16.msra.mxu0 %v454_v3  ;;  %467 = vmatpush.bf16.msra.mxu1 %v454_v3 }
   0xf   :  { %468 = vmatpush.bf16.msra.mxu2 %v454_v3  ;;  %469 = vmatpush.bf16.msra.mxu3 %v454_v3 }
  0x12   :  { %149 = vmatpush.bf16.msra.mxu0 %v453_v4  ;;  %470 = vmatpush.bf16.msra.mxu1 %v453_v4 }
  0x13   :  { %471 = vmatpush.bf16.msra.mxu2 %v453_v4  ;;  %472 = vmatpush.bf16.msra.mxu3 %v453_v4 }
  0x16   :  { %150 = vmatpush.bf16.msra.mxu0 %v452_v5  ;;  %473 = vmatpush.bf16.msra.mxu1 %v452_v5 }
  0x17   :  { %474 = vmatpush.bf16.msra.mxu2 %v452_v5  ;;  %475 = vmatpush.bf16.msra.mxu3 %v452_v5 }
  0x1a   :  { %151 = vmatpush.bf16.msra.mxu0 %v451_v6  ;;  %476 = vmatpush.bf16.msra.mxu1 %v451_v6 }
  0x1b   :  { %477 = vmatpush.bf16.msra.mxu2 %v451_v6  ;;  %478 = vmatpush.bf16.msra.mxu3 %v451_v6 }
  0x1e   :  { %152 = vmatpush.bf16.msra.mxu0 %v450_v7  ;;  %479 = vmatpush.bf16.msra.mxu1 %v450_v7 }
  0x1f   :  { %480 = vmatpush.bf16.msra.mxu2 %v450_v7  ;;  %481 = vmatpush.bf16.msra.mxu3 %v450_v7 }
  0x21   :  { %153 = vmatmul.bf16.vlgmr.msra.gmra.mxu0 %v442_v8  ;;  %163 = vmatmul.bf16.vlgmr.msra.gmra.mxu1 %v444_v9 }
  0x22   :  { %173 = vmatmul.bf16.vlgmr.msra.gmra.mxu2 %v446_v10  ;;  %183 = vmatmul.bf16.vlgmr.msra.gmra.mxu3 %v448_v11 }
  0x31   :  { %158 = vmatmul.bf16.gmra.mxu0 %v443_v12  ;;  %168 = vmatmul.bf16.gmra.mxu1 %v445_v13 }
  0x32   :  { %178 = vmatmul.bf16.gmra.mxu2 %v447_v14  ;;  %188 = vmatmul.bf16.gmra.mxu3 %v449_v15 }
  0x9e   :  { %v557_v16 = vpop.f32.mrf.mxu0  ;;  %v559_v17 = vpop.f32.mrf.mxu1 }
  0x9f   :  { %v247_v26 = vmul.f32 %v557_v16, %v557_v16  ;;  %v251_v36 = vmul.f32 %v559_v17, %v559_v17 }
  0xa5   :  { %v563_v19 = vpop.f32.mrf.mxu2  ;;  %v569_v22 = vpop.f32.mrf.mxu3 }
  0xa6   :  { %v561_v18 = vpop.f32.mrf.mxu0  ;;  %v565_v20 = vpop.f32.mrf.mxu1  ;;  %v255_v50 = vmul.f32 %v563_v19, %v563_v19  ;;  %v259_v0 = vmul.f32 %v569_v22, %v569_v22 }
  0xa7   :  { %v248_v24 = vmul.f32 %v561_v18, %v561_v18  ;;  %v226_v27 = vadd.f32 %v561_v18, %v557_v16  ;;  %v252_v40 = vmul.f32 %v565_v20, %v565_v20 }
  0xa9   :  { %v263_v29 = vadd.f32 %v248_v24, %v247_v26 }
  0xad   :  { %v571_v23 = vpop.f32.mrf.mxu2  ;;  %v589_v35 = vpop.f32.mrf.mxu3 }
  0xae   :  { %v567_v21 = vpop.f32.mrf.mxu0  ;;  %v575_v25 = vpop.f32.mrf.mxu1  ;;  %v256_v54 = vmul.f32 %v571_v23, %v571_v23  ;;  %v260_v3 = vmul.f32 %v589_v35, %v589_v35 }
  0xaf   :  { %v249_v28 = vmul.f32 %v567_v21, %v567_v21  ;;  %v227_v30 = vadd.f32 %v226_v27, %v567_v21  ;;  %v253_v44 = vmul.f32 %v575_v25, %v575_v25 }
  0xb1   :  { %v264_v32 = vadd.f32 %v263_v29, %v249_v28 }
  0xb5   :  { %v594_v39 = vpop.f32.mrf.mxu2  ;;  %v610_v53 = vpop.f32.mrf.mxu3 }
  0xb6   :  { %v584_v31 = vpop.f32.mrf.mxu0  ;;  %v599_v43 = vpop.f32.mrf.mxu1  ;;  %v257_v59 = vmul.f32 %v594_v39, %v594_v39  ;;  %v261_v8 = vmul.f32 %v610_v53, %v610_v53 }
  0xb7   :  { %v228_v33 = vadd.f32 %v227_v30, %v584_v31  ;;  %v250_v34 = vmul.f32 %v584_v31, %v584_v31  ;;  %v254_v48 = vmul.f32 %v599_v43, %v599_v43 }
  0xb9   :  { %v229_v37 = vadd.f32 %v228_v33, %v559_v17  ;;  %v265_v38 = vadd.f32 %v264_v32, %v250_v34 }
  0xbb   :  { %v266_v41 = vadd.f32 %v265_v38, %v251_v36  ;;  %v230_v42 = vadd.f32 %v229_v37, %v565_v20 }
  0xbd   :  { %v231_v45 = vadd.f32 %v230_v42, %v575_v25  ;;  %v267_v46 = vadd.f32 %v266_v41, %v252_v40  ;;  %v615_v57 = vpop.f32.mrf.mxu2  ;;  %v629_v6 = vpop.f32.mrf.mxu3 }
  0xbe   :  { %v258_v63 = vmul.f32 %v615_v57, %v615_v57  ;;  %v262_v12 = vmul.f32 %v629_v6, %v629_v6 }
  0xbf   :  { %v232_v47 = vadd.f32 %v231_v45, %v599_v43  ;;  %v268_v49 = vadd.f32 %v267_v46, %v253_v44 }
  0xc1   :  { %v233_v51 = vadd.f32 %v232_v47, %v563_v19  ;;  %v269_v52 = vadd.f32 %v268_v49, %v254_v48 }
  0xc3   :  { %v270_v55 = vadd.f32 %v269_v52, %v255_v50  ;;  %v234_v56 = vadd.f32 %v233_v51, %v571_v23  ;;  %v300_v51 = vld [vmem:[%s725_s2] sm:$0x1] }
  0xc5   :  { %v235_v58 = vadd.f32 %v234_v56, %v594_v39  ;;  %v271_v60 = vadd.f32 %v270_v55, %v256_v54  ;;  %v302_v55 = vld [vmem:[%s726_s3] sm:$0x1] }
  0xc7   :  { %v272_v61 = vadd.f32 %v271_v60, %v257_v59  ;;  %v236_v62 = vadd.f32 %v235_v58, %v615_v57 }
  0xc9   :  { %v237_v1 = vadd.f32 %v236_v62, %v569_v22  ;;  %v273_v2 = vadd.f32 %v272_v61, %v258_v63 }
  0xcb   :  { %v274_v4 = vadd.f32 %v273_v2, %v259_v0  ;;  %v238_v5 = vadd.f32 %v237_v1, %v589_v35 }
  0xcd   :  { %v239_v7 = vadd.f32 %v238_v5, %v610_v53  ;;  %v275_v9 = vadd.f32 %v274_v4, %v260_v3 }
  0xcf   :  { %v276_v10 = vadd.f32 %v275_v9, %v261_v8  ;;  %v240_v11 = vadd.f32 %v239_v7, %v629_v6 }
  0xd1   :  { %v241_v13 = vrot.slane %v240_v11, 4  ;;  %v277_v14 = vadd.f32 %v276_v10, %v262_v12 }
  0xd3   :  { %v242_v15 = vadd.f32 %v241_v13, %v240_v11  ;;  %v278_v24 = vrot.slane %v277_v14, 4 }
  0xd5   :  { %v243_v26 = vrot.slane %v242_v15, 2  ;;  %v279_v27 = vadd.f32 %v278_v24, %v277_v14 }
  0xd7   :  { %v244_v28 = vadd.f32 %v243_v26, %v242_v15  ;;  %v280_v29 = vrot.slane %v279_v27, 2 }
  0xd9   :  { %v245_v30 = vrot.slane %v244_v28, 1  ;;  %v281_v32 = vadd.f32 %v280_v29, %v279_v27 }
  0xdb   :  { %v246_v33 = vadd.f32 %v245_v30, %v244_v28  ;;  %v282_v34 = vrot.slane %v281_v32, 1 }
  0xdd   :  { %v283_v36 = vadd.f32 %v282_v34, %v281_v32  ;;  %v284_v37 = vmul.f32 0.0078125, %v246_v33 }
  0xdf   :  { %v285_v38 = vmul.f32 0.0078125, %v283_v36  ;;  %v286_v40 = vmul.f32 %v284_v37, %v284_v37 }
  0xe1   :  { %v287_v41 = vsub.f32 %v285_v38, %v286_v40 }
  0xe3   :  { %v288_v42 = vmax.f32 %v287_v41, 0.0 }
  0xe5   :  { %v289_v44 = vadd.f32 1e-05, %v288_v42 }
  0xe7   :  { %482 = vrsqrt.f32 %v289_v44  ;;  %vm296_vm1 = vweird.f32 %v289_v44 }
  0xed   :  { %v483_v45 = vpop.eup %482 }
  0xee   :  { %v291_v46 = vmul.f32 %v483_v45, %v289_v44  ;;  %vm297_vm0 = vweird.f32 %v483_v45 }
  0xef   :  { %vm298_vm2 = vmor %vm296_vm1, %vm297_vm0 }
  0xf0   :  { %v292_v47 = vmul.f32 %v483_v45, %v291_v46 }
  0xf2   :  { %v293_v48 = vmul.f32 0.5, %v292_v47 }
  0xf4   :  { %v294_v49 = vsub.f32 1.5, %v293_v48 }
  0xf6   :  { %v295_v50 = vmul.f32 %v483_v45, %v294_v49 }
  0xf8   :  { %v299_v52 = vsel %vm298_vm2, %v483_v45, %v295_v50 }
  0xf9   :  { %v301_v54 = vmul.f32 %v300_v51, %v299_v52 }
  0xfb   :  { %v303_v56 = vmul.f32 %v301_v54, %v284_v37  ;;  %v305_v59 = vperm.slane %v301_v54, 0 }
  0xfd   :  { %v304_v58 = vsub.f32 %v302_v55, %v303_v56  ;;  %v306_v60 = vmul.f32 %v305_v59, %v557_v16  ;;  %v307_v61 = vmul.f32 %v305_v59, %v561_v18  ;;  %v308_v62 = vmul.f32 %v305_v59, %v567_v21 }
  0xfe   :  { %v309_v0 = vmul.f32 %v305_v59, %v584_v31  ;;  %v310_v1 = vmul.f32 %v305_v59, %v559_v17  ;;  %v311_v5 = vmul.f32 %v305_v59, %v565_v20  ;;  %v312_v8 = vmul.f32 %v305_v59, %v575_v25 }
  0xff   :  { %v323_v63 = vperm.slane %v304_v58, 0  ;;  %v313_v16 = vmul.f32 %v305_v59, %v599_v43  ;;  %v314_v18 = vmul.f32 %v305_v59, %v563_v19  ;;  %v315_v17 = vmul.f32 %v305_v59, %v571_v23 }
 0x100   :  { %v316_v20 = vmul.f32 %v305_v59, %v594_v39  ;;  %v317_v19 = vmul.f32 %v305_v59, %v615_v57  ;;  %v318_v23 = vmul.f32 %v305_v59, %v569_v22  ;;  %v319_v27 = vmul.f32 %v305_v59, %v589_v35 }
 0x101   :  { %v325_v2 = vadd.f32 %v323_v63, %v306_v60  ;;  %v326_v3 = vadd.f32 %v323_v63, %v307_v61  ;;  %v327_v4 = vadd.f32 %v323_v63, %v308_v62  ;;  %v328_v7 = vadd.f32 %v323_v63, %v309_v0 }
 0x102   :  { %v329_v9 = vadd.f32 %v323_v63, %v310_v1  ;;  %v330_v10 = vadd.f32 %v323_v63, %v311_v5  ;;  %v331_v21 = vadd.f32 %v323_v63, %v312_v8  ;;  %v332_v13 = vadd.f32 %v323_v63, %v313_v16 }
 0x103   :  { %v341_v11 = vmax.f32 %v325_v2, 0.0  ;;  %v342_v31 = vmax.f32 %v326_v3, 0.0  ;;  %v343_v12 = vmax.f32 %v327_v4, 0.0  ;;  %v344_v14 = vmax.f32 %v328_v7, 0.0 }
 0x104   :  { %v333_v15 = vadd.f32 %v323_v63, %v314_v18  ;;  %v345_v24 = vmax.f32 %v329_v9, 0.0  ;;  %v334_v25 = vadd.f32 %v323_v63, %v315_v17  ;;  %v346_v43 = vmax.f32 %v330_v10, 0.0 }
 0x105   :  { %358 = vst.msk [vmem:[%s727_s4] sm:$0xff] %vm357_vm3, %v341_v11  ;;  %v335_v26 = vadd.f32 %v323_v63, %v316_v20  ;;  %v347_v39 = vmax.f32 %v331_v21, 0.0  ;;  %v336_v28 = vadd.f32 %v323_v63, %v317_v19  ;;  %v348_v57 = vmax.f32 %v332_v13, 0.0 }
 0x106   :  { %359 = vst.msk [vmem:[%s727_s4 + $0x8] sm:$0xff] %vm357_vm3, %v342_v31  ;;  %v320_v29 = vmul.f32 %v305_v59, %v610_v53  ;;  %v337_v30 = vadd.f32 %v323_v63, %v318_v23  ;;  %v349_v22 = vmax.f32 %v333_v15, 0.0  ;;  %v321_v32 = vmul.f32 %v305_v59, %v629_v6 }
 0x107   :  { %360 = vst.msk [vmem:[%s727_s4 + $0x10] sm:$0xff] %vm357_vm3, %v343_v12  ;;  %v338_v33 = vadd.f32 %v323_v63, %v319_v27  ;;  %v350_v35 = vmax.f32 %v334_v25, 0.0  ;;  %v351_v36 = vmax.f32 %v335_v26, 0.0  ;;  %v352_v37 = vmax.f32 %v336_v28, 0.0 }
 0x108   :  { %361 = vst.msk [vmem:[%s727_s4 + $0x18] sm:$0xff] %vm357_vm3, %v344_v14  ;;  %v339_v34 = vadd.f32 %v323_v63, %v320_v29  ;;  %v340_v53 = vadd.f32 %v323_v63, %v321_v32  ;;  %v353_v6 = vmax.f32 %v337_v30, 0.0 }
 0x109   :  { %362 = vst.msk [vmem:[%s727_s4 + $0x20] sm:$0xff] %vm357_vm3, %v345_v24  ;;  %v354_v38 = vmax.f32 %v338_v33, 0.0 }
 0x10a   :  { %363 = vst.msk [vmem:[%s727_s4 + $0x28] sm:$0xff] %vm357_vm3, %v346_v43  ;;  %v355_v40 = vmax.f32 %v339_v34, 0.0  ;;  %v356_v41 = vmax.f32 %v340_v53, 0.0 }
 0x10b   :  { %364 = vst.msk [vmem:[%s727_s4 + $0x30] sm:$0xff] %vm357_vm3, %v347_v39 }
 0x10c   :  { %365 = vst.msk [vmem:[%s727_s4 + $0x38] sm:$0xff] %vm357_vm3, %v348_v57 }
 0x10d   :  { %366 = vst.msk [vmem:[%s727_s4 + $0x40] sm:$0xff] %vm357_vm3, %v349_v22 }
 0x10e   :  { %367 = vst.msk [vmem:[%s727_s4 + $0x48] sm:$0xff] %vm357_vm3, %v350_v35 }
 0x10f   :  { %368 = vst.msk [vmem:[%s727_s4 + $0x50] sm:$0xff] %vm357_vm3, %v351_v36 }
 0x110   :  { %369 = vst.msk [vmem:[%s727_s4 + $0x58] sm:$0xff] %vm357_vm3, %v352_v37 }
 0x111   :  { %370 = vst.msk [vmem:[%s727_s4 + $0x60] sm:$0xff] %vm357_vm3, %v353_v6 }
 0x112   :  { %371 = vst.msk [vmem:[%s727_s4 + $0x68] sm:$0xff] %vm357_vm3, %v354_v38 }
 0x113   :  { %372 = vst.msk [vmem:[%s727_s4 + $0x70] sm:$0xff] %vm357_vm3, %v355_v40 }
 0x114   :  { %373 = vst.msk [vmem:[%s727_s4 + $0x78] sm:$0xff] %vm357_vm3, %v356_v41 }

</bundles_post_ra>
